<compile_context>
chip_gen: v5e
topology: v5e:2x2
jax: 0.10.0
libtpu: 0.0.40
codegen_flags: <defaults>
</compile_context>

<pallas_src>
import jax
import jax.numpy as jnp
from jax.experimental import pallas as pl
from jax.experimental.pallas import tpu as pltpu

BN_EPS = 1e-5  # nn.BatchNorm2d default eps


def _cdiv(a, b):
    return -(-a // b)


def _round_up(a, b):
    return _cdiv(a, b) * b


def _vmem_budget_bytes():
    """Chip-aware usable VMEM budget (leave headroom for compiler scratch)."""
    try:
        cap = int(pltpu.get_tpu_info().vmem_capacity_bytes)
    except Exception:
        cap = 64 << 20  # conservative fallback (v7x-sized)
    return int(cap * 0.85)  # ~54 MiB on v7x, ~108 MiB on v5e/v6e


def _make_kernel(n_tiles, tm, p, n_valid):
    """Build the fused kernel; static config is closed over."""
    inv_m = 1.0 / float(n_valid)

    def kernel(x_ref, s_ref, o_ref, sum_ref, sq_ref):
        i = pl.program_id(0)

        @pl.when(i == 0)
        def _init():
            sum_ref[...] = jnp.zeros_like(sum_ref)
            sq_ref[...] = jnp.zeros_like(sq_ref)

        # Linear(C->1) on the natural channel-minor layout: one MXU matmul
        # against the block-diagonal kron(I_P, w) matrix gives the compacted
        # (tm, P) z tile directly (no transpose, no lane compaction).
        z = jnp.dot(x_ref[...], s_ref[...], preferred_element_type=jnp.float32)

        # One-pass BN statistics: vector partial sums (pure VPU adds; the
        # single cross-lane reduce happens once, in the finalize phase).
        zr = z.reshape(-1, 8, p)
        sum_ref[...] += jnp.sum(zr, axis=0)
        sq_ref[...] += jnp.sum(zr * zr, axis=0)

        # Stash unnormalized z into the VMEM-resident output slab.
        o_ref[i] = z

        # Finalize: BatchNorm2d(1, affine=False, train-mode stats) + sigmoid,
        # chunked per tile to bound VMEM temporaries.
        @pl.when(i == pl.num_programs(0) - 1)
        def _finalize():
            mean = jnp.sum(sum_ref[...]) * inv_m
            ex2 = jnp.sum(sq_ref[...]) * inv_m
            var = jnp.maximum(ex2 - mean * mean, 0.0)  # biased variance
            inv_std = jax.lax.rsqrt(var + BN_EPS)

            @pl.loop(0, n_tiles)
            def _(t):
                zn = (o_ref[t] - mean) * inv_std
                # Numerically-stable sigmoid: one EUP exp + one approx EUP
                # reciprocal, polished with a single Newton step on the VPU.
                e = jnp.exp(-jnp.abs(zn))
                d = 1.0 + e
                r = pl.reciprocal(d, approx=True)
                r = r * (2.0 - d * r)              # Newton step -> ~f32 accuracy
                o_ref[t] = jnp.where(zn >= 0.0, r, 1.0 - r)

    return kernel


@jax.jit
def ffn_forward(x, w):
    """x: (B, H, W, C) f32 channels-last; w: (1, C) Linear weight -> (B, 1, H, W)."""
    B, H, W_, C = x.shape
    M = B * H * W_            # BN element count (true, un-padded)
    N = M * C                 # flat element count of x
    P = 128                   # spatial positions per vreg row (lane-dense z)
    TLANE = P * C             # x lanes per row (multiple of 128 and of C)
    ELEM = 4                  # f32 bytes

    usable_vmem = _vmem_budget_bytes()
    target_block_bytes = (4 << 20) if usable_vmem < (80 << 20) else (8 << 20)

    # Tile rows: aim for target_block_bytes per x block, multiple of 8 rows,
    # balanced across tiles to keep zero-padding < 8 rows per tile.
    n_rows = _cdiv(N, TLANE)
    tm_target = max(8, (target_block_bytes // (TLANE * ELEM)) // 8 * 8)
    n_tiles = _cdiv(n_rows, tm_target)
    tm = _round_up(_cdiv(n_rows, n_tiles), 8)
    n_rows_pad = n_tiles * tm

    block_bytes = tm * TLANE * ELEM
    slab_bytes = n_rows_pad * P * ELEM
    s_bytes = TLANE * P * ELEM
    # Conservative budget: double-buffered x blocks + (possibly double-buffered)
    # resident slab + S + per-tile temporaries + compiler-scratch headroom.
    vmem_needed = (2 * block_bytes + 2 * slab_bytes + 2 * s_bytes
                   + 4 * tm * P * ELEM + (4 << 20))
    if vmem_needed > usable_vmem:
        # TODO(synk): fall back to a two-pass (stats + normalize) structure.
        raise NotImplementedError(
            f"VMEM-resident z slab ({slab_bytes >> 20} MiB) exceeds the budget "
            f"({usable_vmem >> 20} MiB); two-pass fallback not implemented.")

    # Natural-layout view of x: flat, zero-padded to whole (tm, TLANE) blocks.
    # Pad is a multiple of C, so no spatial position is split; padded positions
    # give z == 0 and are excluded from the stats by dividing by the true M.
    x_flat = x.reshape(-1).astype(jnp.float32)
    pad = n_rows_pad * TLANE - N
    if pad:
        # TODO(synk): avoid this extra copy for ragged N via a masked tail tile.
        x_flat = jnp.pad(x_flat, (0, pad))
    x_rows = x_flat.reshape(n_rows_pad, TLANE)

    # Block-diagonal reduction matrix with the Linear weight folded in:
    # S[p*C + c, p] = w[0, c];  z = x_rows @ S performs the C->1 contraction.
    s_mat = jnp.kron(jnp.eye(P, dtype=jnp.float32),
                     w.reshape(C, 1).astype(jnp.float32))

    kernel = _make_kernel(n_tiles, tm, P, M)

    out = pl.pallas_call(
        kernel,
        out_shape=jax.ShapeDtypeStruct((n_tiles, tm, P), jnp.float32),
        grid=(n_tiles,),
        in_specs=[
            pl.BlockSpec((tm, TLANE), lambda i: (i, 0)),   # streamed x blocks
            pl.BlockSpec((TLANE, P), lambda i: (0, 0)),    # resident reduction matrix
        ],
        # VMEM-resident output slab: written back to HBM once, after the grid.
        out_specs=pl.BlockSpec((n_tiles, tm, P), lambda i: (0, 0, 0)),
        scratch_shapes=[pltpu.VMEM((8, P), jnp.float32),   # running sum(z)
                        pltpu.VMEM((8, P), jnp.float32)],  # running sum(z^2)
        compiler_params=pltpu.CompilerParams(
            # Output slab revisited every step -> reduction-style axis.
            dimension_semantics=("arbitrary",),
            vmem_limit_bytes=usable_vmem,
        ),
    )(x_rows, s_mat)

    return out.reshape(-1)[:M].reshape(B, H, W_)[:, None, :, :]


def ffn_reference(x, w):
    """Pure-JAX reference matching the PyTorch forward (train-mode BN)."""
    z = jnp.einsum("bhwc,c->bhw", x, w[0])          # Linear(C->1).squeeze(-1)
    mean = jnp.mean(z)
    var = jnp.mean((z - mean) ** 2)                 # biased variance
    norm = (z - mean) / jnp.sqrt(var + BN_EPS)
    return jax.nn.sigmoid(norm)[:, None, :, :]      # (B, 1, H, W)


if __name__ == "__main__":
    key = jax.random.PRNGKey(0)
    kx, kw = jax.random.split(key)

    B, H, W_, C = 2, 16, 16, 4
    x = jax.random.normal(kx, (B, H, W_, C), dtype=jnp.float32)
    # Deterministic Linear weight, shape (1, in_channels), no bias.
    w = jax.random.normal(kw, (1, C), dtype=jnp.float32) / jnp.sqrt(float(C))

    y = ffn_forward(x, w)
    jax.block_until_ready(y)

    y_ref = ffn_reference(x, w)
    assert y.shape == (B, 1, H, W_)
    max_err = float(jnp.max(jnp.abs(y - y_ref)))
    assert max_err < 1e-4, max_err

    print("KERNEL_OK")
</pallas_src>

<mosaic_0001>
module attributes {stable_mosaic.version = 11 : i64} {
  func.func @kernel(%arg0: i32, %arg1: memref<8x512xf32, #tpu.memory_space<vmem>>, %arg2: memref<512x128xf32, #tpu.memory_space<vmem>>, %arg3: memref<1x8x128xf32, #tpu.memory_space<vmem>>, %arg4: memref<8x128xf32, #tpu.memory_space<vmem>>, %arg5: memref<8x128xf32, #tpu.memory_space<vmem>>) attributes {dimension_semantics = [#tpu.dimension_semantics<arbitrary>], iteration_bounds = array<i64: 1>, scalar_prefetch = 0 : i64, scratch_operands = 2 : i64, tpu.core_type = #tpu.core_type<tc>, window_params = [{transform_indices = @transform_0, window_bounds = array<i64: 8, 512>}, {pipeline_mode = #tpu.pipeline_mode<synchronous>, transform_indices = @transform_1, window_bounds = array<i64: 512, 128>}, {pipeline_mode = #tpu.pipeline_mode<synchronous>, transform_indices = @transform_2, window_bounds = array<i64: 1, 8, 128>}]} {
    %c0_i32 = arith.constant 0 : i32
    %0 = arith.cmpi eq, %arg0, %c0_i32 : i32
    %1 = arith.extui %0 : i1 to i32
    %c0_i32_0 = arith.constant 0 : i32
    %2 = arith.cmpi ne, %1, %c0_i32_0 : i32
    scf.if %2 {
      %cst_18 = arith.constant 0.000000e+00 : f32
      %23 = vector.broadcast %cst_18 : f32 to vector<8x128xf32>
      %c0_19 = arith.constant 0 : index
      %c0_20 = arith.constant 0 : index
      %24 = vector.load %arg4[%c0_19, %c0_20] : memref<8x128xf32, #tpu.memory_space<vmem>>, vector<8x128xf32>
      tpu.vector_store %arg4[%c0_19, %c0_20], %23 {strides = array<i32>} : memref<8x128xf32, #tpu.memory_space<vmem>>, vector<8x128xf32>,
      %cst_21 = arith.constant 0.000000e+00 : f32
      %25 = vector.broadcast %cst_21 : f32 to vector<8x128xf32>
      %c0_22 = arith.constant 0 : index
      %c0_23 = arith.constant 0 : index
      %26 = vector.load %arg5[%c0_22, %c0_23] : memref<8x128xf32, #tpu.memory_space<vmem>>, vector<8x128xf32>
      tpu.vector_store %arg5[%c0_22, %c0_23], %25 {strides = array<i32>} : memref<8x128xf32, #tpu.memory_space<vmem>>, vector<8x128xf32>,
    } else {
    }
    %c0 = arith.constant 0 : index
    %c0_1 = arith.constant 0 : index
    %3 = vector.load %arg1[%c0, %c0_1] : memref<8x512xf32, #tpu.memory_space<vmem>>, vector<8x512xf32>
    %c0_2 = arith.constant 0 : index
    %c0_3 = arith.constant 0 : index
    %4 = vector.load %arg2[%c0_2, %c0_3] : memref<512x128xf32, #tpu.memory_space<vmem>>, vector<512x128xf32>
    %cst = arith.constant dense<0.000000e+00> : vector<8x128xf32>
    %5 = tpu.matmul %3, %4, %cst {dimension_numbers = #tpu.dot_dimension_numbers<[1], [0], [0], [1], [0, 0, 1, 1], [], []>} : vector<8x512xf32>, vector<512x128xf32>, vector<8x128xf32> -> vector<8x128xf32>
    %6 = vector.shape_cast %5 : vector<8x128xf32> to vector<1x8x128xf32>
    %c0_4 = arith.constant 0 : index
    %c0_5 = arith.constant 0 : index
    %7 = vector.load %arg4[%c0_4, %c0_5] : memref<8x128xf32, #tpu.memory_space<vmem>>, vector<8x128xf32>
    %cst_6 = arith.constant dense<0.000000e+00> : vector<8x128xf32>
    %8 = vector.multi_reduction <add>, %6, %cst_6 [0] : vector<1x8x128xf32> to vector<8x128xf32>
    %9 = arith.addf %7, %8 : vector<8x128xf32>
    %c0_7 = arith.constant 0 : index
    %c0_8 = arith.constant 0 : index
    %10 = vector.load %arg4[%c0_7, %c0_8] : memref<8x128xf32, #tpu.memory_space<vmem>>, vector<8x128xf32>
    tpu.vector_store %arg4[%c0_7, %c0_8], %9 {strides = array<i32>} : memref<8x128xf32, #tpu.memory_space<vmem>>, vector<8x128xf32>,
    %c0_9 = arith.constant 0 : index
    %c0_10 = arith.constant 0 : index
    %11 = vector.load %arg5[%c0_9, %c0_10] : memref<8x128xf32, #tpu.memory_space<vmem>>, vector<8x128xf32>
    %12 = arith.mulf %6, %6 : vector<1x8x128xf32>
    %cst_11 = arith.constant dense<0.000000e+00> : vector<8x128xf32>
    %13 = vector.multi_reduction <add>, %12, %cst_11 [0] : vector<1x8x128xf32> to vector<8x128xf32>
    %14 = arith.addf %11, %13 : vector<8x128xf32>
    %c0_12 = arith.constant 0 : index
    %c0_13 = arith.constant 0 : index
    %15 = vector.load %arg5[%c0_12, %c0_13] : memref<8x128xf32, #tpu.memory_space<vmem>>, vector<8x128xf32>
    tpu.vector_store %arg5[%c0_12, %c0_13], %14 {strides = array<i32>} : memref<8x128xf32, #tpu.memory_space<vmem>>, vector<8x128xf32>,
    %16 = arith.index_cast %arg0 : i32 to index
    %c0_14 = arith.constant 0 : index
    %c0_15 = arith.constant 0 : index
    %17 = vector.load %arg3[%16, %c0_14, %c0_15] : memref<1x8x128xf32, #tpu.memory_space<vmem>>, vector<1x8x128xf32>
    %18 = vector.shape_cast %17 : vector<1x8x128xf32> to vector<8x128xf32>
    %19 = vector.shape_cast %5 : vector<8x128xf32> to vector<1x8x128xf32>
    tpu.vector_store %arg3[%16, %c0_14, %c0_15], %19 {strides = array<i32>} : memref<1x8x128xf32, #tpu.memory_space<vmem>>, vector<1x8x128xf32>,
    %c0_i32_16 = arith.constant 0 : i32
    %20 = arith.cmpi eq, %arg0, %c0_i32_16 : i32
    %21 = arith.extui %20 : i1 to i32
    %c0_i32_17 = arith.constant 0 : i32
    %22 = arith.cmpi ne, %21, %c0_i32_17 : i32
    scf.if %22 {
      %c0_18 = arith.constant 0 : index
      %c0_19 = arith.constant 0 : index
      %23 = vector.load %arg4[%c0_18, %c0_19] : memref<8x128xf32, #tpu.memory_space<vmem>>, vector<8x128xf32>
      %24 = vector.shape_cast %23 : vector<8x128xf32> to vector<1x8x128xf32>
      %cst_20 = arith.constant dense<0.000000e+00> : vector<1xf32>
      %25 = vector.multi_reduction <add>, %24, %cst_20 [1, 2] : vector<1x8x128xf32> to vector<1xf32>
      %26 = vector.shape_cast %25 : vector<1xf32> to vector<1x1x1xf32>
      %27 = vector.extract %26[0, 0, 0] : f32 from vector<1x1x1xf32>
      %cst_21 = arith.constant 0.001953125 : f32
      %28 = arith.mulf %27, %cst_21 : f32
      %c0_22 = arith.constant 0 : index
      %c0_23 = arith.constant 0 : index
      %29 = vector.load %arg5[%c0_22, %c0_23] : memref<8x128xf32, #tpu.memory_space<vmem>>, vector<8x128xf32>
      %30 = vector.shape_cast %29 : vector<8x128xf32> to vector<1x8x128xf32>
      %cst_24 = arith.constant dense<0.000000e+00> : vector<1xf32>
      %31 = vector.multi_reduction <add>, %30, %cst_24 [1, 2] : vector<1x8x128xf32> to vector<1xf32>
      %32 = vector.shape_cast %31 : vector<1xf32> to vector<1x1x1xf32>
      %33 = vector.extract %32[0, 0, 0] : f32 from vector<1x1x1xf32>
      %cst_25 = arith.constant 0.001953125 : f32
      %34 = arith.mulf %33, %cst_25 : f32
      %35 = arith.mulf %28, %28 : f32
      %36 = arith.subf %34, %35 : f32
      %cst_26 = arith.constant 0.000000e+00 : f32
      %37 = arith.maximumf %36, %cst_26 : f32
      %cst_27 = arith.constant 9.99999974E-6 : f32
      %38 = arith.addf %37, %cst_27 : f32
      %39 = math.rsqrt %38 : f32
      %c0_i32_28 = arith.constant 0 : i32
      %c1_i32 = arith.constant 1 : i32
      %40 = arith.muli %c0_i32_28, %c1_i32 : i32
      %c0_i32_29 = arith.constant 0 : i32
      %41 = arith.addi %c0_i32_29, %40 : i32
      %42 = arith.index_cast %41 : i32 to index
      %c0_30 = arith.constant 0 : index
      %c0_31 = arith.constant 0 : index
      %43 = vector.load %arg3[%42, %c0_30, %c0_31] : memref<1x8x128xf32, #tpu.memory_space<vmem>>, vector<1x8x128xf32>
      %44 = vector.shape_cast %43 : vector<1x8x128xf32> to vector<8x128xf32>
      %45 = vector.broadcast %28 : f32 to vector<8x128xf32>
      %46 = arith.subf %44, %45 : vector<8x128xf32>
      %47 = vector.broadcast %39 : f32 to vector<8x128xf32>
      %48 = arith.mulf %46, %47 : vector<8x128xf32>
      %49 = math.absf %48 : vector<8x128xf32>
      %cst_32 = arith.constant 0.000000e+00 : f32
      %50 = vector.broadcast %cst_32 : f32 to vector<8x128xf32>
      %51 = arith.subf %50, %49 : vector<8x128xf32>
      %52 = math.exp %51 : vector<8x128xf32>
      %cst_33 = arith.constant 1.000000e+00 : f32
      %53 = vector.broadcast %cst_33 : f32 to vector<8x128xf32>
      %54 = arith.addf %53, %52 : vector<8x128xf32>
      %55 = tpu.reciprocal %54 {approx = true} : vector<8x128xf32> -> vector<8x128xf32>
      %56 = arith.mulf %54, %55 : vector<8x128xf32>
      %cst_34 = arith.constant 2.000000e+00 : f32
      %57 = vector.broadcast %cst_34 : f32 to vector<8x128xf32>
      %58 = arith.subf %57, %56 : vector<8x128xf32>
      %59 = arith.mulf %55, %58 : vector<8x128xf32>
      %cst_35 = arith.constant 0.000000e+00 : f32
      %60 = vector.broadcast %cst_35 : f32 to vector<8x128xf32>
      %61 = arith.cmpf oge, %48, %60 : vector<8x128xf32>
      %cst_36 = arith.constant 1.000000e+00 : f32
      %62 = vector.broadcast %cst_36 : f32 to vector<8x128xf32>
      %63 = arith.subf %62, %59 : vector<8x128xf32>
      %64 = arith.select %61, %59, %63 : vector<8x128xi1>, vector<8x128xf32>
      %65 = arith.index_cast %41 : i32 to index
      %c0_37 = arith.constant 0 : index
      %c0_38 = arith.constant 0 : index
      %66 = vector.load %arg3[%65, %c0_37, %c0_38] : memref<1x8x128xf32, #tpu.memory_space<vmem>>, vector<1x8x128xf32>
      %67 = vector.shape_cast %66 : vector<1x8x128xf32> to vector<8x128xf32>
      %68 = vector.shape_cast %64 : vector<8x128xf32> to vector<1x8x128xf32>
      tpu.vector_store %arg3[%65, %c0_37, %c0_38], %68 {strides = array<i32>} : memref<1x8x128xf32, #tpu.memory_space<vmem>>, vector<1x8x128xf32>,
      %c1_i32_39 = arith.constant 1 : i32
    } else {
    }
    return
  }
  func.func @transform_0(%arg0: i32) -> (i32, i32) {
    %c0_i32 = arith.constant 0 : i32
    %c0_i32_0 = arith.constant 0 : i32
    return %arg0, %c0_i32 : i32, i32
  }
  func.func @transform_1(%arg0: i32) -> (i32, i32) {
    %c0_i32 = arith.constant 0 : i32
    %c0_i32_0 = arith.constant 0 : i32
    %c0_i32_1 = arith.constant 0 : i32
    return %c0_i32, %c0_i32_0 : i32, i32
  }
  func.func @transform_2(%arg0: i32) -> (i32, i32, i32) {
    %c0_i32 = arith.constant 0 : i32
    %c0_i32_0 = arith.constant 0 : i32
    %c0_i32_1 = arith.constant 0 : i32
    %c0_i32_2 = arith.constant 0 : i32
    return %c0_i32, %c0_i32_0, %c0_i32_1 : i32, i32, i32
  }
}

</mosaic_0001>

<bundles_post_ra>
// kernel: ffn_forward.1
= control target key start
LH: loop header
LB: loop body
LE: loop exit
PB: predicated region body
PF: predicated region fallthrough
CT: control target
= control target key end

     0   :  { %s253_s9 = smov 0.0   ;;  %s476_s1 = inlined_call_operand.vmem [shape: f32[512,128], index: 1, kind: input, shape index: {}]   ;;  %s477_s0 = inlined_call_operand.vmem [shape: f32[8,512], index: 0, kind: input, shape index: {}]   ;;  %s478_s2 = inlined_call_operand.vmem [shape: f32[1,8,128], index: 2, kind: output, shape index: {}]  }
   0x1   :  { %v68_v0 = vld [vmem:[%s476_s1 + $0x178] sm:$0xff]  ;;  %v67_v1 = vld [vmem:[%s476_s1 + $0x170] sm:$0xff]  ;;  %v66_v5 = vld [vmem:[%s476_s1 + $0x168] sm:$0xff] }
   0x2   :  { %v84_v2 = vld [vmem:[%s476_s1 + $0x1f8] sm:$0xff]  ;;  %125 = vmatpush.msra.mxu2 %v68_v0  ;;  %v83_v6 = vld [vmem:[%s476_s1 + $0x1f0] sm:$0xff]  ;;  %v82_v9 = vld [vmem:[%s476_s1 + $0x1e8] sm:$0xff] }
   0x3   :  { %145 = vmatpush.msra.mxu3 %v84_v2  ;;  %v36_v3 = vld [vmem:[%s476_s1 + $0x78] sm:$0xff]  ;;  %v35_v7 = vld [vmem:[%s476_s1 + $0x70] sm:$0xff]  ;;  %v34_v10 = vld [vmem:[%s476_s1 + $0x68] sm:$0xff] }
   0x4   :  { %v52_v4 = vld [vmem:[%s476_s1 + $0xf8] sm:$0xff]  ;;  %85 = vmatpush.msra.mxu0 %v36_v3  ;;  %v51_v8 = vld [vmem:[%s476_s1 + $0xf0] sm:$0xff]  ;;  %126 = vmatpush.msra.mxu2 %v67_v1  ;;  %v65_v11 = vld [vmem:[%s476_s1 + $0x160] sm:$0xff] }
   0x5   :  { %105 = vmatpush.msra.mxu1 %v52_v4  ;;  %146 = vmatpush.msra.mxu3 %v83_v6  ;;  %v50_v12 = vld [vmem:[%s476_s1 + $0xe8] sm:$0xff]  ;;  %v81_v13 = vld [vmem:[%s476_s1 + $0x1e0] sm:$0xff]  ;;  %v64_v16 = vld [vmem:[%s476_s1 + $0x158] sm:$0xff] }
   0x6   :  { %86 = vmatpush.msra.mxu0 %v35_v7  ;;  %127 = vmatpush.msra.mxu2 %v66_v5  ;;  %v33_v14 = vld [vmem:[%s476_s1 + $0x60] sm:$0xff]  ;;  %v80_v17 = vld [vmem:[%s476_s1 + $0x1d8] sm:$0xff]  ;;  %v63_v20 = vld [vmem:[%s476_s1 + $0x150] sm:$0xff] }
   0x7   :  { %106 = vmatpush.msra.mxu1 %v51_v8  ;;  %147 = vmatpush.msra.mxu3 %v82_v9  ;;  %v49_v15 = vld [vmem:[%s476_s1 + $0xe0] sm:$0xff]  ;;  %v32_v18 = vld [vmem:[%s476_s1 + $0x58] sm:$0xff]  ;;  %v79_v21 = vld [vmem:[%s476_s1 + $0x1d0] sm:$0xff] }
   0x8   :  { %87 = vmatpush.msra.mxu0 %v34_v10  ;;  %128 = vmatpush.msra.mxu2 %v65_v11  ;;  %v48_v19 = vld [vmem:[%s476_s1 + $0xd8] sm:$0xff]  ;;  %v31_v22 = vld [vmem:[%s476_s1 + $0x50] sm:$0xff]  ;;  %v62_v24 = vld [vmem:[%s476_s1 + $0x148] sm:$0xff] }
   0x9   :  { %107 = vmatpush.msra.mxu1 %v50_v12  ;;  %148 = vmatpush.msra.mxu3 %v81_v13  ;;  %v47_v23 = vld [vmem:[%s476_s1 + $0xd0] sm:$0xff]  ;;  %v78_v25 = vld [vmem:[%s476_s1 + $0x1c8] sm:$0xff]  ;;  %v61_v28 = vld [vmem:[%s476_s1 + $0x140] sm:$0xff] }
   0xa   :  { %88 = vmatpush.msra.mxu0 %v33_v14  ;;  %129 = vmatpush.msra.mxu2 %v64_v16  ;;  %v30_v26 = vld [vmem:[%s476_s1 + $0x48] sm:$0xff]  ;;  %v77_v29 = vld [vmem:[%s476_s1 + $0x1c0] sm:$0xff]  ;;  %v60_v32 = vld [vmem:[%s476_s1 + $0x138] sm:$0xff] }
   0xb   :  { %108 = vmatpush.msra.mxu1 %v49_v15  ;;  %149 = vmatpush.msra.mxu3 %v80_v17  ;;  %v46_v27 = vld [vmem:[%s476_s1 + $0xc8] sm:$0xff]  ;;  %v29_v30 = vld [vmem:[%s476_s1 + $0x40] sm:$0xff]  ;;  %v76_v33 = vld [vmem:[%s476_s1 + $0x1b8] sm:$0xff] }
   0xc   :  { %89 = vmatpush.msra.mxu0 %v32_v18  ;;  %130 = vmatpush.msra.mxu2 %v63_v20  ;;  %v45_v31 = vld [vmem:[%s476_s1 + $0xc0] sm:$0xff]  ;;  %v28_v34 = vld [vmem:[%s476_s1 + $0x38] sm:$0xff]  ;;  %v59_v36 = vld [vmem:[%s476_s1 + $0x130] sm:$0xff] }
   0xd   :  { %109 = vmatpush.msra.mxu1 %v48_v19  ;;  %150 = vmatpush.msra.mxu3 %v79_v21  ;;  %v44_v35 = vld [vmem:[%s476_s1 + $0xb8] sm:$0xff]  ;;  %v75_v37 = vld [vmem:[%s476_s1 + $0x1b0] sm:$0xff]  ;;  %v58_v40 = vld [vmem:[%s476_s1 + $0x128] sm:$0xff] }
   0xe   :  { %90 = vmatpush.msra.mxu0 %v31_v22  ;;  %131 = vmatpush.msra.mxu2 %v62_v24  ;;  %v27_v38 = vld [vmem:[%s476_s1 + $0x30] sm:$0xff]  ;;  %v74_v41 = vld [vmem:[%s476_s1 + $0x1a8] sm:$0xff]  ;;  %v57_v44 = vld [vmem:[%s476_s1 + $0x120] sm:$0xff] }
   0xf   :  { %110 = vmatpush.msra.mxu1 %v47_v23  ;;  %151 = vmatpush.msra.mxu3 %v78_v25  ;;  %v43_v39 = vld [vmem:[%s476_s1 + $0xb0] sm:$0xff]  ;;  %v26_v42 = vld [vmem:[%s476_s1 + $0x28] sm:$0xff]  ;;  %v73_v45 = vld [vmem:[%s476_s1 + $0x1a0] sm:$0xff] }
  0x10   :  { %91 = vmatpush.msra.mxu0 %v30_v26  ;;  %132 = vmatpush.msra.mxu2 %v61_v28  ;;  %v42_v43 = vld [vmem:[%s476_s1 + $0xa8] sm:$0xff]  ;;  %v25_v46 = vld [vmem:[%s476_s1 + $0x20] sm:$0xff]  ;;  %v56_v48 = vld [vmem:[%s476_s1 + $0x118] sm:$0xff] }
  0x11   :  { %111 = vmatpush.msra.mxu1 %v46_v27  ;;  %152 = vmatpush.msra.mxu3 %v77_v29  ;;  %v41_v47 = vld [vmem:[%s476_s1 + $0xa0] sm:$0xff]  ;;  %v72_v49 = vld [vmem:[%s476_s1 + $0x198] sm:$0xff]  ;;  %v55_v52 = vld [vmem:[%s476_s1 + $0x110] sm:$0xff] }
  0x12   :  { %92 = vmatpush.msra.mxu0 %v29_v30  ;;  %133 = vmatpush.msra.mxu2 %v60_v32  ;;  %v24_v50 = vld [vmem:[%s476_s1 + $0x18] sm:$0xff]  ;;  %v71_v53 = vld [vmem:[%s476_s1 + $0x190] sm:$0xff]  ;;  %v54_v56 = vld [vmem:[%s476_s1 + $0x108] sm:$0xff] }
  0x13   :  { %112 = vmatpush.msra.mxu1 %v45_v31  ;;  %153 = vmatpush.msra.mxu3 %v76_v33  ;;  %v40_v51 = vld [vmem:[%s476_s1 + $0x98] sm:$0xff]  ;;  %v23_v54 = vld [vmem:[%s476_s1 + $0x10] sm:$0xff]  ;;  %v70_v57 = vld [vmem:[%s476_s1 + $0x188] sm:$0xff] }
  0x14   :  { %93 = vmatpush.msra.mxu0 %v28_v34  ;;  %134 = vmatpush.msra.mxu2 %v59_v36  ;;  %v39_v55 = vld [vmem:[%s476_s1 + $0x90] sm:$0xff]  ;;  %v22_v58 = vld [vmem:[%s476_s1 + $0x8] sm:$0xff]  ;;  %v53_v60 = vld [vmem:[%s476_s1 + $0x100] sm:$0xff] }
  0x15   :  { %113 = vmatpush.msra.mxu1 %v44_v35  ;;  %154 = vmatpush.msra.mxu3 %v75_v37  ;;  %v38_v59 = vld [vmem:[%s476_s1 + $0x88] sm:$0xff]  ;;  %v69_v61 = vld [vmem:[%s476_s1 + $0x180] sm:$0xff]  ;;  %v19_v62 = vld [vmem:[%s477_s0 + $0x10] sm:$0xff] }
  0x16   :  { %94 = vmatpush.msra.mxu0 %v27_v38  ;;  %135 = vmatpush.msra.mxu2 %v58_v40  ;;  %v20_v63 = vld [vmem:[%s477_s0 + $0x18] sm:$0xff]  ;;  %v21_v0 = vld [vmem:[%s476_s1] sm:$0xff]  ;;  %v18_v3 = vld [vmem:[%s477_s0 + $0x8] sm:$0xff] }
  0x17   :  { %114 = vmatpush.msra.mxu1 %v43_v39  ;;  %155 = vmatpush.msra.mxu3 %v74_v41  ;;  %v37_v1 = vld [vmem:[%s476_s1 + $0x80] sm:$0xff] }
  0x18   :  { %95 = vmatpush.msra.mxu0 %v26_v42  ;;  %136 = vmatpush.msra.mxu2 %v57_v44  ;;  %v17_v2 = vld [vmem:[%s477_s0] sm:$0xff] }
  0x19   :  { %115 = vmatpush.msra.mxu1 %v42_v43  ;;  %156 = vmatpush.msra.mxu3 %v73_v45 }
  0x1a   :  { %96 = vmatpush.msra.mxu0 %v25_v46  ;;  %137 = vmatpush.msra.mxu2 %v56_v48 }
  0x1b   :  { %116 = vmatpush.msra.mxu1 %v41_v47  ;;  %157 = vmatpush.msra.mxu3 %v72_v49 }
  0x1c   :  { %97 = vmatpush.msra.mxu0 %v24_v50  ;;  %138 = vmatpush.msra.mxu2 %v55_v52 }
  0x1d   :  { %117 = vmatpush.msra.mxu1 %v40_v51  ;;  %158 = vmatpush.msra.mxu3 %v71_v53 }
  0x1e   :  { %98 = vmatpush.msra.mxu0 %v23_v54  ;;  %139 = vmatpush.msra.mxu2 %v54_v56 }
  0x1f   :  { %118 = vmatpush.msra.mxu1 %v39_v55  ;;  %159 = vmatpush.msra.mxu3 %v70_v57 }
  0x20   :  { %99 = vmatpush.msra.mxu0 %v22_v58  ;;  %140 = vmatpush.msra.mxu2 %v53_v60 }
  0x21   :  { %119 = vmatpush.msra.mxu1 %v38_v59  ;;  %160 = vmatpush.msra.mxu3 %v69_v61 }
  0x22   :  { %141 = vmatmul.f32.vlgmr.msra.gmra.mxu2 %v19_v62  ;;  %161 = vmatmul.f32.vlgmr.msra.gmra.mxu3 %v20_v63 }
  0x23   :  { %100 = vmatpush.msra.mxu0 %v21_v0  ;;  %120 = vmatpush.msra.mxu1 %v37_v1 }
  0x24   :  { %101 = vmatmul.f32.vlgmr.msra.gmra.mxu0 %v17_v2  ;;  %121 = vmatmul.f32.vlgmr.msra.gmra.mxu1 %v18_v3 }
  0xa1   :  { %v102_v4 = vpop.f32.mrf.mxu0  ;;  %v122_v5 = vpop.f32.mrf.mxu1 }
  0xa2   :  { %v123_v6 = vadd.f32 %v122_v5, %v102_v4 }
  0xa5   :  { %v142_v7 = vpop.f32.mrf.mxu2  ;;  %v162_v8 = vpop.f32.mrf.mxu3 }
  0xa6   :  { %v143_v9 = vadd.f32 %v142_v7, %v123_v6 }
  0xa8   :  { %v163_v10 = vadd.f32 %v162_v8, %v143_v9 }
  0xaa   :  { %181 = vadd.xlane.f32.xlu0 %v163_v10  ;;  %v170_v11 = vmul.f32 %v163_v10, %v163_v10 }
  0xb2   :  { %192 = vadd.xlane.f32.xlu0 %v170_v11 }
 0x11d   :  { %v182_v12 = vpop.xlane.xlu0 %181 }
 0x11e   :  { %v183_v13 = vrot.slane %v182_v12, 4 }
 0x120   :  { %v184_v14 = vadd.f32 %v183_v13, %v182_v12 }
 0x122   :  { %v185_v15 = vrot.slane %v184_v14, 2 }
 0x124   :  { %v186_v16 = vadd.f32 %v185_v15, %v184_v14 }
 0x125   :  { %v193_v17 = vpop.xlane.xlu0 %192 }
 0x126   :  { %v194_v18 = vrot.slane %v193_v17, 4  ;;  %v187_v19 = vrot.slane %v186_v16, 1 }
 0x128   :  { %v195_v20 = vadd.f32 %v194_v18, %v193_v17  ;;  %v188_v21 = vadd.f32 %v187_v19, %v186_v16 }
 0x12a   :  { %v196_v22 = vrot.slane %v195_v20, 2  ;;  %240 = vpush %v188_v21 }
 0x12c   :  { %v197_v23 = vadd.f32 %v196_v22, %v195_v20 }
 0x12e   :  { %v198_v24 = vrot.slane %v197_v23, 1 }
 0x130   :  { %v199_v25 = vadd.f32 %v198_v24, %v197_v23 }
 0x132   :  { %242 = vpush %v199_v25 }
 0x15b   :  { %s241_s0 = spop %240 }
 0x15c   :  { %s190_s1 = smul.f32 0.001953125, %s241_s0 }
 0x15e   :  { %s202_s5 = smul.f32 %s190_s1, %s190_s1  ;;  %v219_v34 = vstv %s190_s1 }
 0x15f   :  { %v220_v35 = vsub.f32 %v163_v10, %v219_v34 }
 0x163   :  { %s243_s6 = spop %242 }
 0x164   :  { %s201_s7 = smul.f32 0.001953125, %s243_s6 }
 0x166   :  { %s203_s8 = ssub.f32 %s201_s7, %s202_s5 }
 0x168   :  { %s204_s10 = smax.f32 %s253_s9, %s203_s8 }
 0x169   :  { %s205_s11 = sadd.f32 1e-05, %s204_s10 }
 0x16b   :  { %v206_v26 = vstv %s205_s11 }
 0x16c   :  { %247 = vrsqrt.f32 %v206_v26  ;;  %vm213_vm1 = vweird.f32 %v206_v26 }
 0x172   :  { %v248_v27 = vpop.eup %247 }
 0x173   :  { %v208_v28 = vmul.f32 %v248_v27, %v206_v26  ;;  %vm214_vm0 = vweird.f32 %v248_v27 }
 0x174   :  { %vm215_vm2 = vmor %vm213_vm1, %vm214_vm0 }
 0x175   :  { %v209_v29 = vmul.f32 %v248_v27, %v208_v28 }
 0x177   :  { %v210_v30 = vmul.f32 0.5, %v209_v29 }
 0x179   :  { %v211_v31 = vsub.f32 1.5, %v210_v30 }
 0x17b   :  { %v212_v32 = vmul.f32 %v248_v27, %v211_v31 }
 0x17d   :  { %v216_v33 = vsel %vm215_vm2, %v248_v27, %v212_v32 }
 0x17e   :  { %244 = vpush %v216_v33 }
 0x1af   :  { %s245_s12 = spop %244 }
 0x1b0   :  { %v221_v36 = vstv %s245_s12 }
 0x1b1   :  { %v222_v37 = vmul.f32 %v221_v36, %v220_v35 }
 0x1b3   :  { %v223_v38 = vand.u32 2147483647, %v222_v37  ;;  %vm232_vm3 = vcmp.ge.f32.partialorder %v222_v37, 0.0 }
 0x1b5   :  { %v224_v39 = vsub.f32 0.0, %v223_v38 }
 0x1b7   :  { %v225_v40 = vmul.f32 1.442695, %v224_v39 }
 0x1b9   :  { %249 = vpow2.f32 %v225_v40 }
 0x1bf   :  { %v250_v41 = vpop.eup %249 }
 0x1c0   :  { %v227_v42 = vadd.f32 1.0, %v250_v41 }
 0x1c2   :  { %251 = vrcp.f32 %v227_v42 }
 0x1c8   :  { %v252_v43 = vpop.eup %251 }
 0x1c9   :  { %v229_v44 = vmul.f32 %v252_v43, %v227_v42 }
 0x1cb   :  { %v230_v45 = vsub.f32 2.0, %v229_v44 }
 0x1cd   :  { %v231_v46 = vmul.f32 %v252_v43, %v230_v45 }
 0x1cf   :  { %v233_v47 = vsub.f32 1.0, %v231_v46 }
 0x1d1   :  { %v234_v48 = vsel %vm232_vm3, %v231_v46, %v233_v47 }
 0x1d2   :  { %235 = vst [vmem:[%s478_s2] sm:$0xff] %v234_v48 }

</bundles_post_ra>
